<compile_context>
chip_gen: v7x
topology: tpu7x:2x2x1
jax: 0.10.0
libtpu: 0.0.40
codegen_flags: <defaults>
</compile_context>

<pallas_src>
import math

import numpy as np
import jax
import jax.numpy as jnp
from jax.experimental import pallas as pl
from jax.experimental.pallas import tpu as pltpu

# ----- small, deterministic config (mirrors HIDDEN_SIZE / heads / SEQ_LENGTH of the module) -----
HIDDEN_SIZE = 32
NUM_ATTENTION_HEADS = 4
HEAD_DIM = HIDDEN_SIZE // NUM_ATTENTION_HEADS           # 8
NUM_KEY_VALUE_HEADS = 2
GQA_GROUP = NUM_ATTENTION_HEADS // NUM_KEY_VALUE_HEADS  # 2
SEQ_LENGTH = 8                                          # past KV-cache length
INTERMEDIATE_SIZE = 64
NUM_LAYERS = 4                                          # layers stacked under one pallas_call
RMS_EPS = 1e-6
ROPE_BASE = 10000.0
DTYPE = jnp.float32            # activations / KV cache / outputs
WEIGHT_DTYPE = jnp.bfloat16    # learned weights stored bf16, fed to the MXU as bf16

Q_WIDTH = NUM_ATTENTION_HEADS * HEAD_DIM      # 32
KV_WIDTH = NUM_KEY_VALUE_HEADS * HEAD_DIM     # 16
KVPACK = 2 * KV_WIDTH                         # 32  (K|V packed per cache row)

# ---- packed bf16 weight-slab column layout (per layer, 64 rows x 384 cols) ----
W_ROWS = 2 * HIDDEN_SIZE                      # 64 (wd needs INTERMEDIATE_SIZE rows)
W_QKV = (0, 128)     # [ q(32) | k(16) | v(16) | rot(q)(32) | rot(k)(16) | 0(16) ], rows 0..31
W_GU = (128, 256)    # [ gate(64) | up(64) ], rows 0..31
W_O = (256, 288)     # wo, rows 0..31
W_D = (288, 320)     # wd, rows 0..63
W_LN = (320, 352)    # row 0 = ln1, row 1 = ln2
W_COLS = 384

# ---- shared f32 constant-slab column layout (32 rows x 128 cols) ----
_GSEG = (0, NUM_ATTENTION_HEADS)                                   # (32,4)  lane->head reduce (pre-scaled)
_REP = (_GSEG[1], _GSEG[1] + 2 * HIDDEN_SIZE)                      # (32,64) K|V -> GQA-replicated K|V
_GEXP = (_REP[1], _REP[1] + HIDDEN_SIZE)                           # (4,32)  head->lanes expansion
CONST_COLS = 128


# --------------------------------------------------------------------------------------
# Pallas kernel: one decoder layer per grid step; hidden state resident across the grid.
# --------------------------------------------------------------------------------------
def block_cache_kernel(pos_ref, cs_ref, x_ref, mask_ref, const_ref, w_ref, kvp_ref,
                       out_ref, kv_ref):
    f32, bf16 = jnp.float32, jnp.bfloat16
    layer = pl.program_id(0)

    # hidden-state carry: out block has a constant index -> stays in VMEM for all layers and
    # is written back to HBM only once after the last layer.
    @pl.when(layer == 0)
    def _():
        out_ref[...] = x_ref[...]

    x = out_ref[...].astype(f32)                                         # (1, H)

    # per-layer parameters, sliced statically out of the single packed bf16 slab
    ln1 = w_ref[0, 0:1, W_LN[0]:W_LN[1]].astype(f32)                     # (1, 32)
    ln2 = w_ref[0, 1:2, W_LN[0]:W_LN[1]].astype(f32)
    wqkv = w_ref[0, 0:HIDDEN_SIZE, W_QKV[0]:W_QKV[1]]                    # (32, 128) bf16
    wgu = w_ref[0, 0:HIDDEN_SIZE, W_GU[0]:W_GU[1]]                       # (32, 128) bf16
    wo = w_ref[0, 0:HIDDEN_SIZE, W_O[0]:W_O[1]]                          # (32, 32)  bf16
    wd = w_ref[0, 0:INTERMEDIATE_SIZE, W_D[0]:W_D[1]]                    # (64, 32)  bf16

    # ---- input RMSNorm ----
    var = jnp.mean(x * x, axis=-1, keepdims=True)
    xn = x * jax.lax.rsqrt(var + RMS_EPS) * ln1

    # ---- fused [q | k | v | rot(q) | rot(k) | 0] projection: ONE bf16 MXU pass ----
    qkv = jnp.dot(xn.astype(bf16), wqkv, preferred_element_type=f32)     # (1, 128)

    # ---- RoPE: purely elementwise with one pre-tiled [cos_q|cos_kv|sin_q|sin_kv] row ----
    pos = pos_ref[0]
    cs = cs_ref[pl.ds(pos, 1), :]                                        # (1, 128) f32
    roped = qkv[:, 0:64] * cs[:, 0:64] + qkv[:, 64:128] * cs[:, 64:128]  # (1, 64)
    q_rope = roped[:, 0:HIDDEN_SIZE]                                     # (1, 32) all q heads
    kv_new = roped[:, HIDDEN_SIZE:2 * HIDDEN_SIZE]                       # (1, 32) = [k_rope | v]

    # ---- KV cache: past rows + the new row; one lane-dense store, reused from vregs ----
    kv_past = kvp_ref[0].astype(f32)                                     # (S, 32)
    kv_all = jnp.concatenate([kv_past, kv_new], axis=0)                  # (S+1, 32)
    kv_ref[0] = kv_all.astype(kv_ref.dtype)                              # writeback drains later

    # ---- attention, all heads at once (positions in sublanes, heads in lanes) ----
    rep = const_ref[0:KVPACK, _REP[0]:_REP[1]]                           # (32, 64) 0/1
    krep_vrep = jnp.dot(kv_all, rep, preferred_element_type=f32)         # GQA replication on MXU
    k_rep = krep_vrep[:, 0:HIDDEN_SIZE]                                  # (S+1, 32)
    v_rep = krep_vrep[:, HIDDEN_SIZE:2 * HIDDEN_SIZE]                    # (S+1, 32)

    gseg_s = const_ref[0:HIDDEN_SIZE, _GSEG[0]:_GSEG[1]]                 # (32, 4), 1/sqrt(d) folded in
    s = jnp.dot(k_rep * q_rope, gseg_s, preferred_element_type=f32)      # (S+1, NH)
    s = s + mask_ref[...]

    m = jnp.max(s, axis=0, keepdims=True)
    p = jnp.exp(s - m)
    denom = jnp.sum(p, axis=0, keepdims=True)
    p = p * pl.reciprocal(denom, approx=True)                            # EUP reciprocal

    gexp = const_ref[0:NUM_ATTENTION_HEADS, _GEXP[0]:_GEXP[1]]           # (4, 32)
    p_lanes = jnp.dot(p, gexp, preferred_element_type=f32)               # (S+1, 32)
    attn = jnp.sum(p_lanes * v_rep, axis=0, keepdims=True)               # (1, 32)

    attn_out = jnp.dot(attn.astype(bf16), wo, preferred_element_type=f32)
    h1 = x + attn_out

    # ---- post-attention RMSNorm + SwiGLU MLP (gate|up fused, 128-lane intermediate) ----
    var2 = jnp.mean(h1 * h1, axis=-1, keepdims=True)
    hn = h1 * jax.lax.rsqrt(var2 + RMS_EPS) * ln2
    gu = jnp.dot(hn.astype(bf16), wgu, preferred_element_type=f32)       # (1, 128)
    g = gu[:, 0:INTERMEDIATE_SIZE]
    u = gu[:, INTERMEDIATE_SIZE:2 * INTERMEDIATE_SIZE]
    act = g * jax.nn.sigmoid(g) * u
    mlp = jnp.dot(act.astype(bf16), wd, preferred_element_type=f32)      # (1, 32)

    out_ref[...] = (h1 + mlp).astype(out_ref.dtype)


# --------------------------------------------------------------------------------------
# Wrapper (layout plumbing + pallas_call).  Runs NUM_LAYERS chained BlockCache layers in one
# launch; with a single layer this is exactly the module's forward.
# --------------------------------------------------------------------------------------
def block_cache_forward(packed, hidden_states, position_ids, attention_mask, past_k, past_v):
    """
    hidden_states:  (1, 1, H)
    position_ids:   (1, 1) int
    attention_mask: (1, 1, 1, S+1) additive
    past_k, past_v: (L, 1, KV, S, D)   -- one cache per stacked layer
    returns: hidden (1, 1, H), present_k/present_v (L, 1, KV, S+1, D)
    """
    L = past_k.shape[0]
    x = hidden_states.reshape(1, HIDDEN_SIZE).astype(DTYPE)
    pos = jnp.clip(position_ids.reshape(-1)[:1].astype(jnp.int32), 0, SEQ_LENGTH - 1)
    mask_b = jnp.broadcast_to(
        attention_mask.reshape(SEQ_LENGTH + 1, 1),
        (SEQ_LENGTH + 1, NUM_ATTENTION_HEADS)).astype(DTYPE)

    # lane-dense packed cache: row j = [k head0 | k head1 | v head0 | v head1]  (L, S, 32)
    kpack = jnp.transpose(past_k.reshape(L, NUM_KEY_VALUE_HEADS, SEQ_LENGTH, HEAD_DIM),
                          (0, 2, 1, 3)).reshape(L, SEQ_LENGTH, KV_WIDTH)
    vpack = jnp.transpose(past_v.reshape(L, NUM_KEY_VALUE_HEADS, SEQ_LENGTH, HEAD_DIM),
                          (0, 2, 1, 3)).reshape(L, SEQ_LENGTH, KV_WIDTH)
    kv_pack = jnp.concatenate([kpack, vpack], axis=-1).astype(DTYPE)

    grid_spec = pltpu.PrefetchScalarGridSpec(
        num_scalar_prefetch=1,
        grid=(L,),
        in_specs=[
            pl.BlockSpec((SEQ_LENGTH, 4 * HIDDEN_SIZE), lambda l, p: (0, 0)),           # cos/sin table
            pl.BlockSpec((1, HIDDEN_SIZE), lambda l, p: (0, 0)),                        # x0
            pl.BlockSpec((SEQ_LENGTH + 1, NUM_ATTENTION_HEADS), lambda l, p: (0, 0)),   # mask
            pl.BlockSpec((HIDDEN_SIZE, CONST_COLS), lambda l, p: (0, 0)),               # const slab
            pl.BlockSpec((1, W_ROWS, W_COLS), lambda l, p: (l, 0, 0)),                  # weights (per layer)
            pl.BlockSpec((1, SEQ_LENGTH, KVPACK), lambda l, p: (l, 0, 0)),              # past KV (per layer)
        ],
        out_specs=(
            pl.BlockSpec((1, HIDDEN_SIZE), lambda l, p: (0, 0)),                        # hidden (resident)
            pl.BlockSpec((1, SEQ_LENGTH + 1, KVPACK), lambda l, p: (l, 0, 0)),          # new KV (per layer)
        ),
    )

    out, kv_out = pl.pallas_call(
        block_cache_kernel,
        grid_spec=grid_spec,
        out_shape=(
            jax.ShapeDtypeStruct((1, HIDDEN_SIZE), DTYPE),
            jax.ShapeDtypeStruct((L, SEQ_LENGTH + 1, KVPACK), DTYPE),
        ),
        compiler_params=pltpu.CompilerParams(dimension_semantics=("arbitrary",)),
    )(pos, packed["cos_sin"], x, mask_b, packed["const"], packed["wslab"], kv_pack)

    # unpack the lane-dense cache back to the module's (1, KV, S+1, D) layout (free plumbing)
    k_out = kv_out[:, :, :KV_WIDTH].reshape(L, SEQ_LENGTH + 1, NUM_KEY_VALUE_HEADS, HEAD_DIM)
    v_out = kv_out[:, :, KV_WIDTH:].reshape(L, SEQ_LENGTH + 1, NUM_KEY_VALUE_HEADS, HEAD_DIM)
    present_k = jnp.transpose(k_out, (0, 2, 1, 3))[:, None]
    present_v = jnp.transpose(v_out, (0, 2, 1, 3))[:, None]
    return out.reshape(1, 1, HIDDEN_SIZE), present_k, present_v


# --------------------------------------------------------------------------------------
# Deterministic parameters, rotary tables, and host-side slab packing
# --------------------------------------------------------------------------------------
def init_params(key):
    ks = jax.random.split(key, 9)

    def lin(k, fan_in, fan_out):
        return (jax.random.normal(k, (fan_in, fan_out), dtype=jnp.float32) * 0.02
                ).astype(WEIGHT_DTYPE)

    return {
        "ln1": (1.0 + 0.1 * jax.random.normal(ks[7], (1, HIDDEN_SIZE))).astype(WEIGHT_DTYPE),
        "wq": lin(ks[0], HIDDEN_SIZE, Q_WIDTH),
        "wk": lin(ks[1], HIDDEN_SIZE, KV_WIDTH),
        "wv": lin(ks[2], HIDDEN_SIZE, KV_WIDTH),
        "wo": lin(ks[3], Q_WIDTH, HIDDEN_SIZE),
        "ln2": (1.0 + 0.1 * jax.random.normal(ks[8], (1, HIDDEN_SIZE))).astype(WEIGHT_DTYPE),
        "wg": lin(ks[4], HIDDEN_SIZE, INTERMEDIATE_SIZE),
        "wu": lin(ks[5], HIDDEN_SIZE, INTERMEDIATE_SIZE),
        "wd": lin(ks[6], INTERMEDIATE_SIZE, HIDDEN_SIZE),
    }


def make_rope_tables():
    # mirrors self.rotary_emb(value_states, position_ids=range(SEQ_LENGTH)) in __init__
    inv_freq = 1.0 / (ROPE_BASE ** (jnp.arange(0, HEAD_DIM, 2, dtype=jnp.float32) / HEAD_DIM))
    pos = jnp.arange(SEQ_LENGTH, dtype=jnp.float32)
    freqs = pos[:, None] * inv_freq[None, :]
    emb = jnp.concatenate([freqs, freqs], axis=-1)        # (S, D)
    return jnp.cos(emb), jnp.sin(emb)


def make_cos_sin_table():
    """Per-position row [cos_q(32) | cos_kv_ext(32) | sin_q(32) | sin_kv_ext(32)] so that
    RoPE (and the identity pass-through of V) is a single elementwise multiply-add."""
    cos, sin = make_rope_tables()                                           # (S, 8) each
    ones = jnp.ones((SEQ_LENGTH, KV_WIDTH), jnp.float32)
    zeros = jnp.zeros((SEQ_LENGTH, KV_WIDTH), jnp.float32)
    cos_q = jnp.tile(cos, (1, NUM_ATTENTION_HEADS))                         # (S, 32)
    sin_q = jnp.tile(sin, (1, NUM_ATTENTION_HEADS))
    cos_kv = jnp.concatenate([jnp.tile(cos, (1, NUM_KEY_VALUE_HEADS)), ones], axis=1)
    sin_kv = jnp.concatenate([jnp.tile(sin, (1, NUM_KEY_VALUE_HEADS)), zeros], axis=1)
    return jnp.concatenate([cos_q, cos_kv, sin_q, sin_kv], axis=1)          # (S, 128)


def rotate_half_columns(w):
    """x @ rotate_half_columns(w) == rotate_half(x @ w), per HEAD_DIM block of output columns."""
    n_in, n_out = w.shape
    w3 = w.reshape(n_in, n_out // HEAD_DIM, HEAD_DIM)
    half = HEAD_DIM // 2
    rot = jnp.concatenate([-w3[..., half:], w3[..., :half]], axis=-1)
    return rot.reshape(n_in, n_out)


def pack_layer_weights(p):
    wq, wk, wv = p["wq"], p["wk"], p["wv"]
    wqkv_ext = jnp.concatenate(
        [wq, wk, wv, rotate_half_columns(wq), rotate_half_columns(wk),
         jnp.zeros((HIDDEN_SIZE, KV_WIDTH), WEIGHT_DTYPE)], axis=1)          # (32, 128)
    slab = jnp.zeros((W_ROWS, W_COLS), dtype=WEIGHT_DTYPE)
    slab = slab.at[0:HIDDEN_SIZE, W_QKV[0]:W_QKV[1]].set(wqkv_ext)
    slab = slab.at[0:HIDDEN_SIZE, W_GU[0]:W_GU[1]].set(
        jnp.concatenate([p["wg"], p["wu"]], axis=1))
    slab = slab.at[0:HIDDEN_SIZE, W_O[0]:W_O[1]].set(p["wo"])
    slab = slab.at[0:INTERMEDIATE_SIZE, W_D[0]:W_D[1]].set(p["wd"])
    slab = slab.at[0:1, W_LN[0]:W_LN[1]].set(p["ln1"])
    slab = slab.at[1:2, W_LN[0]:W_LN[1]].set(p["ln2"])
    return slab


def make_const_slab():
    # NOTE: valid because KVPACK == HIDDEN_SIZE == 32 rows for this config.
    gseg = np.zeros((HIDDEN_SIZE, NUM_ATTENTION_HEADS), np.float32)
    for lane in range(HIDDEN_SIZE):
        gseg[lane, lane // HEAD_DIM] = 1.0
    rep = np.zeros((KVPACK, 2 * HIDDEN_SIZE), np.float32)
    for qh in range(NUM_ATTENTION_HEADS):
        kvh = qh // GQA_GROUP
        for d in range(HEAD_DIM):
            rep[kvh * HEAD_DIM + d, qh * HEAD_DIM + d] = 1.0                          # K replication
            rep[KV_WIDTH + kvh * HEAD_DIM + d, HIDDEN_SIZE + qh * HEAD_DIM + d] = 1.0  # V replication
    c = np.zeros((HIDDEN_SIZE, CONST_COLS), np.float32)
    c[:, _GSEG[0]:_GSEG[1]] = gseg / math.sqrt(HEAD_DIM)     # fold the attention scale in
    c[0:KVPACK, _REP[0]:_REP[1]] = rep
    c[0:NUM_ATTENTION_HEADS, _GEXP[0]:_GEXP[1]] = gseg.T
    return jnp.asarray(c)


def pack_params(params_list):
    return {
        "wslab": jnp.stack([pack_layer_weights(p) for p in params_list]),   # (L, 64, 384) bf16
        "const": make_const_slab(),                                         # (32, 128) f32
        "cos_sin": make_cos_sin_table(),                                    # (S, 128) f32
    }


# --------------------------------------------------------------------------------------
# Pure-JAX reference for one layer (same bf16-stored weights, f32 math)
# --------------------------------------------------------------------------------------
def reference_layer(p, cos_t, sin_t, x, pos, mask_row, past_k, past_v):
    f32 = jnp.float32
    wq = p["wq"].astype(f32); wk = p["wk"].astype(f32); wv = p["wv"].astype(f32)
    wo = p["wo"].astype(f32); wg = p["wg"].astype(f32); wu = p["wu"].astype(f32)
    wd = p["wd"].astype(f32)
    ln1 = p["ln1"].astype(f32); ln2 = p["ln2"].astype(f32)

    cos = jax.lax.dynamic_slice_in_dim(cos_t, pos, 1, axis=0)
    sin = jax.lax.dynamic_slice_in_dim(sin_t, pos, 1, axis=0)

    def rope(t):
        half = HEAD_DIM // 2
        rot = jnp.concatenate([-t[:, half:], t[:, :half]], axis=-1)
        return t * cos + rot * sin

    var = jnp.mean(x * x, axis=-1, keepdims=True)
    xn = x * jax.lax.rsqrt(var + RMS_EPS) * ln1
    q = xn @ wq
    k = xn @ wk
    v = xn @ wv

    outs, pk_list, pv_list = [], [], []
    for h in range(NUM_KEY_VALUE_HEADS):
        k_new = rope(k[:, h * HEAD_DIM:(h + 1) * HEAD_DIM])
        v_new = v[:, h * HEAD_DIM:(h + 1) * HEAD_DIM]
        k_all = jnp.concatenate([past_k[h], k_new], axis=0)
        v_all = jnp.concatenate([past_v[h], v_new], axis=0)
        pk_list.append(k_all)
        pv_list.append(v_all)
        for g in range(GQA_GROUP):
            head = h * GQA_GROUP + g
            q_h = rope(q[:, head * HEAD_DIM:(head + 1) * HEAD_DIM])
            s = (q_h @ k_all.T) / math.sqrt(HEAD_DIM) + mask_row
            prob = jax.nn.softmax(s, axis=-1)
            outs.append(prob @ v_all)
    attn = jnp.concatenate(outs, axis=-1) @ wo
    h1 = x + attn
    var2 = jnp.mean(h1 * h1, axis=-1, keepdims=True)
    hn = h1 * jax.lax.rsqrt(var2 + RMS_EPS) * ln2
    gp = hn @ wg
    up = hn @ wu
    mlp = ((gp * jax.nn.sigmoid(gp)) * up) @ wd
    return h1 + mlp, jnp.stack(pk_list), jnp.stack(pv_list)


if __name__ == "__main__":
    key = jax.random.PRNGKey(0)
    k_layers, kx, kk, kv = jax.random.split(key, 4)
    layer_keys = jax.random.split(k_layers, NUM_LAYERS)
    params = [init_params(k) for k in layer_keys]
    packed = pack_params(params)

    hidden_states = jax.random.normal(kx, (1, 1, HIDDEN_SIZE), dtype=DTYPE)
    position_ids = jnp.array([[SEQ_LENGTH - 1]], dtype=jnp.int32)
    # additive mask over (past SEQ_LENGTH + 1 new) positions; mask out position 0 as an example
    attention_mask = jnp.zeros((1, 1, 1, SEQ_LENGTH + 1), dtype=DTYPE).at[..., 0].set(-1e9)
    past_k = jax.random.normal(
        kk, (NUM_LAYERS, 1, NUM_KEY_VALUE_HEADS, SEQ_LENGTH, HEAD_DIM), dtype=DTYPE)
    past_v = jax.random.normal(
        kv, (NUM_LAYERS, 1, NUM_KEY_VALUE_HEADS, SEQ_LENGTH, HEAD_DIM), dtype=DTYPE)

    out, present_k, present_v = block_cache_forward(
        packed, hidden_states, position_ids, attention_mask, past_k, past_v)
    out, present_k, present_v = jax.block_until_ready((out, present_k, present_v))

    # reference: chain the single-layer BlockCache math over all stacked layers
    cos_t, sin_t = make_rope_tables()
    x_val = hidden_states.reshape(1, HIDDEN_SIZE).astype(jnp.float32)
    mask_row = attention_mask.reshape(1, SEQ_LENGTH + 1).astype(jnp.float32)
    pos_val = position_ids[0, 0]
    rk_list, rv_list = [], []
    for l in range(NUM_LAYERS):
        x_val, pk_l, pv_l = reference_layer(
            params[l], cos_t, sin_t, x_val, pos_val, mask_row,
            past_k[l, 0].astype(jnp.float32), past_v[l, 0].astype(jnp.float32))
        rk_list.append(pk_l)
        rv_list.append(pv_l)
    ref_out = x_val.reshape(1, 1, HIDDEN_SIZE)
    ref_k = jnp.stack(rk_list)[:, None]
    ref_v = jnp.stack(rv_list)[:, None]

    assert out.shape == (1, 1, HIDDEN_SIZE)
    assert present_k.shape == (NUM_LAYERS, 1, NUM_KEY_VALUE_HEADS, SEQ_LENGTH + 1, HEAD_DIM)
    assert present_v.shape == present_k.shape
    # bf16-fed MXU + approx reciprocal -> small, well-bounded deviation from the f32 reference
    assert jnp.allclose(out, ref_out, atol=1e-2, rtol=1e-2), float(jnp.max(jnp.abs(out - ref_out)))
    assert jnp.allclose(present_k, ref_k, atol=1e-2, rtol=1e-2)
    assert jnp.allclose(present_v, ref_v, atol=1e-2, rtol=1e-2)

    print("KERNEL_OK")
</pallas_src>

<mosaic_0001>
module attributes {stable_mosaic.version = 11 : i64} {
  func.func @block_cache_kernel(%arg0: i32, %arg1: memref<1xi32, #tpu.memory_space<smem>>, %arg2: memref<8x128xf32, #tpu.memory_space<vmem>>, %arg3: memref<1x32xf32, #tpu.memory_space<vmem>>, %arg4: memref<9x4xf32, #tpu.memory_space<vmem>>, %arg5: memref<32x128xf32, #tpu.memory_space<vmem>>, %arg6: memref<1x64x384xbf16, #tpu.memory_space<vmem>>, %arg7: memref<1x8x32xf32, #tpu.memory_space<vmem>>, %arg8: memref<1x32xf32, #tpu.memory_space<vmem>>, %arg9: memref<1x9x32xf32, #tpu.memory_space<vmem>>) attributes {dimension_semantics = [#tpu.dimension_semantics<arbitrary>], iteration_bounds = array<i64: 4>, scalar_prefetch = 1 : i64, scratch_operands = 0 : i64, tpu.core_type = #tpu.core_type<tc>, window_params = [{pipeline_mode = #tpu.pipeline_mode<synchronous>, transform_indices = @transform_0, window_bounds = array<i64: 8, 128>}, {pipeline_mode = #tpu.pipeline_mode<synchronous>, transform_indices = @transform_1, window_bounds = array<i64: 1, 32>}, {pipeline_mode = #tpu.pipeline_mode<synchronous>, transform_indices = @transform_2, window_bounds = array<i64: 9, 4>}, {pipeline_mode = #tpu.pipeline_mode<synchronous>, transform_indices = @transform_3, window_bounds = array<i64: 32, 128>}, {transform_indices = @transform_4, window_bounds = array<i64: 1, 64, 384>}, {transform_indices = @transform_5, window_bounds = array<i64: 1, 8, 32>}, {pipeline_mode = #tpu.pipeline_mode<synchronous>, transform_indices = @transform_6, window_bounds = array<i64: 1, 32>}, {transform_indices = @transform_7, window_bounds = array<i64: 1, 9, 32>}]} {
    %c0_i32 = arith.constant 0 : i32
    %0 = arith.cmpi eq, %arg0, %c0_i32 : i32
    %1 = arith.extui %0 : i1 to i32
    %c0_i32_0 = arith.constant 0 : i32
    %2 = arith.cmpi ne, %1, %c0_i32_0 : i32
    scf.if %2 {
      %c0_47 = arith.constant 0 : index
      %c0_48 = arith.constant 0 : index
      %103 = vector.load %arg3[%c0_47, %c0_48] : memref<1x32xf32, #tpu.memory_space<vmem>>, vector<1x32xf32>
      %c0_49 = arith.constant 0 : index
      %c0_50 = arith.constant 0 : index
      %104 = vector.load %arg8[%c0_49, %c0_50] : memref<1x32xf32, #tpu.memory_space<vmem>>, vector<1x32xf32>
      tpu.vector_store %arg8[%c0_49, %c0_50], %103 {strides = array<i32>} : memref<1x32xf32, #tpu.memory_space<vmem>>, vector<1x32xf32>,
    } else {
    }
    %c0 = arith.constant 0 : index
    %c0_1 = arith.constant 0 : index
    %3 = vector.load %arg8[%c0, %c0_1] : memref<1x32xf32, #tpu.memory_space<vmem>>, vector<1x32xf32>
    %c0_2 = arith.constant 0 : index
    %c0_3 = arith.constant 0 : index
    %c320 = arith.constant 320 : index
    %4 = vector.load %arg6[%c0_2, %c0_3, %c320] : memref<1x64x384xbf16, #tpu.memory_space<vmem>>, vector<1x1x32xbf16>
    %5 = vector.shape_cast %4 : vector<1x1x32xbf16> to vector<1x32xbf16>
    %6 = arith.extf %5 : vector<1x32xbf16> to vector<1x32xf32>
    %c0_4 = arith.constant 0 : index
    %c1 = arith.constant 1 : index
    %c320_5 = arith.constant 320 : index
    %7 = vector.load %arg6[%c0_4, %c1, %c320_5] : memref<1x64x384xbf16, #tpu.memory_space<vmem>>, vector<1x1x32xbf16>
    %8 = vector.shape_cast %7 : vector<1x1x32xbf16> to vector<1x32xbf16>
    %9 = arith.extf %8 : vector<1x32xbf16> to vector<1x32xf32>
    %c0_6 = arith.constant 0 : index
    %c0_7 = arith.constant 0 : index
    %c0_8 = arith.constant 0 : index
    %10 = vector.load %arg6[%c0_6, %c0_7, %c0_8] : memref<1x64x384xbf16, #tpu.memory_space<vmem>>, vector<1x32x128xbf16>
    %11 = vector.shape_cast %10 : vector<1x32x128xbf16> to vector<32x128xbf16>
    %c0_9 = arith.constant 0 : index
    %c0_10 = arith.constant 0 : index
    %c128 = arith.constant 128 : index
    %12 = vector.load %arg6[%c0_9, %c0_10, %c128] : memref<1x64x384xbf16, #tpu.memory_space<vmem>>, vector<1x32x128xbf16>
    %13 = vector.shape_cast %12 : vector<1x32x128xbf16> to vector<32x128xbf16>
    %c0_11 = arith.constant 0 : index
    %c0_12 = arith.constant 0 : index
    %c256 = arith.constant 256 : index
    %14 = vector.load %arg6[%c0_11, %c0_12, %c256] : memref<1x64x384xbf16, #tpu.memory_space<vmem>>, vector<1x32x32xbf16>
    %15 = vector.shape_cast %14 : vector<1x32x32xbf16> to vector<32x32xbf16>
    %c0_13 = arith.constant 0 : index
    %c0_14 = arith.constant 0 : index
    %c288 = arith.constant 288 : index
    %16 = vector.load %arg6[%c0_13, %c0_14, %c288] : memref<1x64x384xbf16, #tpu.memory_space<vmem>>, vector<1x64x32xbf16>
    %17 = vector.shape_cast %16 : vector<1x64x32xbf16> to vector<64x32xbf16>
    %18 = arith.mulf %3, %3 : vector<1x32xf32>
    %cst = arith.constant dense<0.000000e+00> : vector<1xf32>
    %19 = vector.multi_reduction <add>, %18, %cst [1] : vector<1x32xf32> to vector<1xf32>
    %20 = vector.shape_cast %19 : vector<1xf32> to vector<1x1xf32>
    %cst_15 = arith.constant 3.200000e+01 : f32
    %21 = vector.broadcast %cst_15 : f32 to vector<1x1xf32>
    %22 = arith.divf %20, %21 : vector<1x1xf32>
    %cst_16 = arith.constant 9.99999997E-7 : f32
    %23 = vector.broadcast %cst_16 : f32 to vector<1x1xf32>
    %24 = arith.addf %22, %23 : vector<1x1xf32>
    %25 = math.rsqrt %24 : vector<1x1xf32>
    %26 = vector.broadcast %25 : vector<1x1xf32> to vector<1x32xf32>
    %27 = arith.mulf %3, %26 : vector<1x32xf32>
    %28 = arith.mulf %27, %6 : vector<1x32xf32>
    %29 = arith.truncf %28 : vector<1x32xf32> to vector<1x32xbf16>
    %cst_17 = arith.constant dense<0.000000e+00> : vector<1x128xf32>
    %30 = tpu.matmul %29, %11, %cst_17 {dimension_numbers = #tpu.dot_dimension_numbers<[1], [0], [0], [1], [0, 0, 1, 1], [], []>} : vector<1x32xbf16>, vector<32x128xbf16>, vector<1x128xf32> -> vector<1x128xf32>
    %c0_18 = arith.constant 0 : index
    %31 = memref.load %arg1[%c0_18] : memref<1xi32, #tpu.memory_space<smem>>
    %32 = arith.index_cast %31 : i32 to index
    %c0_19 = arith.constant 0 : index
    %33 = vector.load %arg2[%32, %c0_19] : memref<8x128xf32, #tpu.memory_space<vmem>>, vector<1x128xf32>
    %34 = vector.extract_strided_slice %30 {offsets = [0, 0], sizes = [1, 64], strides = [1, 1]} : vector<1x128xf32> to vector<1x64xf32>
    %35 = vector.extract_strided_slice %33 {offsets = [0, 0], sizes = [1, 64], strides = [1, 1]} : vector<1x128xf32> to vector<1x64xf32>
    %36 = arith.mulf %34, %35 : vector<1x64xf32>
    %37 = vector.extract_strided_slice %30 {offsets = [0, 64], sizes = [1, 64], strides = [1, 1]} : vector<1x128xf32> to vector<1x64xf32>
    %38 = vector.extract_strided_slice %33 {offsets = [0, 64], sizes = [1, 64], strides = [1, 1]} : vector<1x128xf32> to vector<1x64xf32>
    %39 = arith.mulf %37, %38 : vector<1x64xf32>
    %40 = arith.addf %36, %39 : vector<1x64xf32>
    %41 = vector.extract_strided_slice %40 {offsets = [0, 0], sizes = [1, 32], strides = [1, 1]} : vector<1x64xf32> to vector<1x32xf32>
    %42 = vector.extract_strided_slice %40 {offsets = [0, 32], sizes = [1, 32], strides = [1, 1]} : vector<1x64xf32> to vector<1x32xf32>
    %c0_20 = arith.constant 0 : index
    %c0_21 = arith.constant 0 : index
    %c0_22 = arith.constant 0 : index
    %43 = vector.load %arg7[%c0_20, %c0_21, %c0_22] : memref<1x8x32xf32, #tpu.memory_space<vmem>>, vector<1x8x32xf32>
    %44 = vector.shape_cast %43 : vector<1x8x32xf32> to vector<8x32xf32>
    %45 = tpu.concatenate %44, %42 in 0 : vector<8x32xf32>, vector<1x32xf32> -> vector<9x32xf32>
    %c0_23 = arith.constant 0 : index
    %c0_24 = arith.constant 0 : index
    %c0_25 = arith.constant 0 : index
    %46 = vector.load %arg9[%c0_23, %c0_24, %c0_25] : memref<1x9x32xf32, #tpu.memory_space<vmem>>, vector<1x9x32xf32>
    %47 = vector.shape_cast %46 : vector<1x9x32xf32> to vector<9x32xf32>
    %48 = vector.shape_cast %45 : vector<9x32xf32> to vector<1x9x32xf32>
    tpu.vector_store %arg9[%c0_23, %c0_24, %c0_25], %48 {strides = array<i32>} : memref<1x9x32xf32, #tpu.memory_space<vmem>>, vector<1x9x32xf32>,
    %c0_26 = arith.constant 0 : index
    %c4 = arith.constant 4 : index
    %49 = vector.load %arg5[%c0_26, %c4] : memref<32x128xf32, #tpu.memory_space<vmem>>, vector<32x64xf32>
    %cst_27 = arith.constant dense<0.000000e+00> : vector<9x64xf32>
    %50 = tpu.matmul %45, %49, %cst_27 {dimension_numbers = #tpu.dot_dimension_numbers<[1], [0], [0], [1], [0, 0, 1, 1], [], []>} : vector<9x32xf32>, vector<32x64xf32>, vector<9x64xf32> -> vector<9x64xf32>
    %51 = vector.extract_strided_slice %50 {offsets = [0, 0], sizes = [9, 32], strides = [1, 1]} : vector<9x64xf32> to vector<9x32xf32>
    %52 = vector.extract_strided_slice %50 {offsets = [0, 32], sizes = [9, 32], strides = [1, 1]} : vector<9x64xf32> to vector<9x32xf32>
    %c0_28 = arith.constant 0 : index
    %c0_29 = arith.constant 0 : index
    %53 = vector.load %arg5[%c0_28, %c0_29] : memref<32x128xf32, #tpu.memory_space<vmem>>, vector<32x4xf32>
    %54 = vector.broadcast %41 : vector<1x32xf32> to vector<9x32xf32>
    %55 = arith.mulf %51, %54 : vector<9x32xf32>
    %cst_30 = arith.constant dense<0.000000e+00> : vector<9x4xf32>
    %56 = tpu.matmul %55, %53, %cst_30 {dimension_numbers = #tpu.dot_dimension_numbers<[1], [0], [0], [1], [0, 0, 1, 1], [], []>} : vector<9x32xf32>, vector<32x4xf32>, vector<9x4xf32> -> vector<9x4xf32>
    %c0_31 = arith.constant 0 : index
    %c0_32 = arith.constant 0 : index
    %57 = vector.load %arg4[%c0_31, %c0_32] : memref<9x4xf32, #tpu.memory_space<vmem>>, vector<9x4xf32>
    %58 = arith.addf %56, %57 : vector<9x4xf32>
    %cst_33 = arith.constant dense<0xFF800000> : vector<4xf32>
    %59 = vector.multi_reduction <maximumf>, %58, %cst_33 [0] : vector<9x4xf32> to vector<4xf32>
    %60 = vector.shape_cast %59 : vector<4xf32> to vector<1x4xf32>
    %61 = vector.broadcast %60 : vector<1x4xf32> to vector<9x4xf32>
    %62 = arith.subf %58, %61 : vector<9x4xf32>
    %63 = math.exp %62 : vector<9x4xf32>
    %cst_34 = arith.constant dense<0.000000e+00> : vector<4xf32>
    %64 = vector.multi_reduction <add>, %63, %cst_34 [0] : vector<9x4xf32> to vector<4xf32>
    %65 = vector.shape_cast %64 : vector<4xf32> to vector<1x4xf32>
    %66 = tpu.reciprocal %65 {approx = true} : vector<1x4xf32> -> vector<1x4xf32>
    %67 = vector.broadcast %66 : vector<1x4xf32> to vector<9x4xf32>
    %68 = arith.mulf %63, %67 : vector<9x4xf32>
    %c0_35 = arith.constant 0 : index
    %c68 = arith.constant 68 : index
    %69 = vector.load %arg5[%c0_35, %c68] : memref<32x128xf32, #tpu.memory_space<vmem>>, vector<4x32xf32>
    %cst_36 = arith.constant dense<0.000000e+00> : vector<9x32xf32>
    %70 = tpu.matmul %68, %69, %cst_36 {dimension_numbers = #tpu.dot_dimension_numbers<[1], [0], [0], [1], [0, 0, 1, 1], [], []>} : vector<9x4xf32>, vector<4x32xf32>, vector<9x32xf32> -> vector<9x32xf32>
    %71 = arith.mulf %70, %52 : vector<9x32xf32>
    %cst_37 = arith.constant dense<0.000000e+00> : vector<32xf32>
    %72 = vector.multi_reduction <add>, %71, %cst_37 [0] : vector<9x32xf32> to vector<32xf32>
    %73 = vector.shape_cast %72 : vector<32xf32> to vector<1x32xf32>
    %74 = arith.truncf %73 : vector<1x32xf32> to vector<1x32xbf16>
    %cst_38 = arith.constant dense<0.000000e+00> : vector<1x32xf32>
    %75 = tpu.matmul %74, %15, %cst_38 {dimension_numbers = #tpu.dot_dimension_numbers<[1], [0], [0], [1], [0, 0, 1, 1], [], []>} : vector<1x32xbf16>, vector<32x32xbf16>, vector<1x32xf32> -> vector<1x32xf32>
    %76 = arith.addf %3, %75 : vector<1x32xf32>
    %77 = arith.mulf %76, %76 : vector<1x32xf32>
    %cst_39 = arith.constant dense<0.000000e+00> : vector<1xf32>
    %78 = vector.multi_reduction <add>, %77, %cst_39 [1] : vector<1x32xf32> to vector<1xf32>
    %79 = vector.shape_cast %78 : vector<1xf32> to vector<1x1xf32>
    %cst_40 = arith.constant 3.200000e+01 : f32
    %80 = vector.broadcast %cst_40 : f32 to vector<1x1xf32>
    %81 = arith.divf %79, %80 : vector<1x1xf32>
    %cst_41 = arith.constant 9.99999997E-7 : f32
    %82 = vector.broadcast %cst_41 : f32 to vector<1x1xf32>
    %83 = arith.addf %81, %82 : vector<1x1xf32>
    %84 = math.rsqrt %83 : vector<1x1xf32>
    %85 = vector.broadcast %84 : vector<1x1xf32> to vector<1x32xf32>
    %86 = arith.mulf %76, %85 : vector<1x32xf32>
    %87 = arith.mulf %86, %9 : vector<1x32xf32>
    %88 = arith.truncf %87 : vector<1x32xf32> to vector<1x32xbf16>
    %cst_42 = arith.constant dense<0.000000e+00> : vector<1x128xf32>
    %89 = tpu.matmul %88, %13, %cst_42 {dimension_numbers = #tpu.dot_dimension_numbers<[1], [0], [0], [1], [0, 0, 1, 1], [], []>} : vector<1x32xbf16>, vector<32x128xbf16>, vector<1x128xf32> -> vector<1x128xf32>
    %90 = vector.extract_strided_slice %89 {offsets = [0, 0], sizes = [1, 64], strides = [1, 1]} : vector<1x128xf32> to vector<1x64xf32>
    %91 = vector.extract_strided_slice %89 {offsets = [0, 64], sizes = [1, 64], strides = [1, 1]} : vector<1x128xf32> to vector<1x64xf32>
    %92 = arith.negf %90 : vector<1x64xf32>
    %93 = math.exp %92 : vector<1x64xf32>
    %cst_43 = arith.constant 1.000000e+00 : f32
    %94 = vector.broadcast %cst_43 : f32 to vector<1x64xf32>
    %95 = arith.addf %94, %93 : vector<1x64xf32>
    %96 = arith.divf %94, %95 : vector<1x64xf32>
    %97 = arith.mulf %90, %96 : vector<1x64xf32>
    %98 = arith.mulf %97, %91 : vector<1x64xf32>
    %99 = arith.truncf %98 : vector<1x64xf32> to vector<1x64xbf16>
    %cst_44 = arith.constant dense<0.000000e+00> : vector<1x32xf32>
    %100 = tpu.matmul %99, %17, %cst_44 {dimension_numbers = #tpu.dot_dimension_numbers<[1], [0], [0], [1], [0, 0, 1, 1], [], []>} : vector<1x64xbf16>, vector<64x32xbf16>, vector<1x32xf32> -> vector<1x32xf32>
    %101 = arith.addf %76, %100 : vector<1x32xf32>
    %c0_45 = arith.constant 0 : index
    %c0_46 = arith.constant 0 : index
    %102 = vector.load %arg8[%c0_45, %c0_46] : memref<1x32xf32, #tpu.memory_space<vmem>>, vector<1x32xf32>
    tpu.vector_store %arg8[%c0_45, %c0_46], %101 {strides = array<i32>} : memref<1x32xf32, #tpu.memory_space<vmem>>, vector<1x32xf32>,
    return
  }
  func.func @transform_0(%arg0: i32, %arg1: memref<1xi32, #tpu.memory_space<smem>>) -> (i32, i32) {
    %c0_i32 = arith.constant 0 : i32
    %c0_i32_0 = arith.constant 0 : i32
    %c0_i32_1 = arith.constant 0 : i32
    return %c0_i32, %c0_i32_0 : i32, i32
  }
  func.func @transform_1(%arg0: i32, %arg1: memref<1xi32, #tpu.memory_space<smem>>) -> (i32, i32) {
    %c0_i32 = arith.constant 0 : i32
    %c0_i32_0 = arith.constant 0 : i32
    %c0_i32_1 = arith.constant 0 : i32
    return %c0_i32, %c0_i32_0 : i32, i32
  }
  func.func @transform_2(%arg0: i32, %arg1: memref<1xi32, #tpu.memory_space<smem>>) -> (i32, i32) {
    %c0_i32 = arith.constant 0 : i32
    %c0_i32_0 = arith.constant 0 : i32
    %c0_i32_1 = arith.constant 0 : i32
    return %c0_i32, %c0_i32_0 : i32, i32
  }
  func.func @transform_3(%arg0: i32, %arg1: memref<1xi32, #tpu.memory_space<smem>>) -> (i32, i32) {
    %c0_i32 = arith.constant 0 : i32
    %c0_i32_0 = arith.constant 0 : i32
    %c0_i32_1 = arith.constant 0 : i32
    return %c0_i32, %c0_i32_0 : i32, i32
  }
  func.func @transform_4(%arg0: i32, %arg1: memref<1xi32, #tpu.memory_space<smem>>) -> (i32, i32, i32) {
    %c0_i32 = arith.constant 0 : i32
    %c0_i32_0 = arith.constant 0 : i32
    %c0_i32_1 = arith.constant 0 : i32
    return %arg0, %c0_i32, %c0_i32_0 : i32, i32, i32
  }
  func.func @transform_5(%arg0: i32, %arg1: memref<1xi32, #tpu.memory_space<smem>>) -> (i32, i32, i32) {
    %c0_i32 = arith.constant 0 : i32
    %c0_i32_0 = arith.constant 0 : i32
    %c0_i32_1 = arith.constant 0 : i32
    return %arg0, %c0_i32, %c0_i32_0 : i32, i32, i32
  }
  func.func @transform_6(%arg0: i32, %arg1: memref<1xi32, #tpu.memory_space<smem>>) -> (i32, i32) {
    %c0_i32 = arith.constant 0 : i32
    %c0_i32_0 = arith.constant 0 : i32
    %c0_i32_1 = arith.constant 0 : i32
    return %c0_i32, %c0_i32_0 : i32, i32
  }
  func.func @transform_7(%arg0: i32, %arg1: memref<1xi32, #tpu.memory_space<smem>>) -> (i32, i32, i32) {
    %c0_i32 = arith.constant 0 : i32
    %c0_i32_0 = arith.constant 0 : i32
    %c0_i32_1 = arith.constant 0 : i32
    return %arg0, %c0_i32, %c0_i32_0 : i32, i32, i32
  }
}

</mosaic_0001>

<bundles_post_ra>
// kernel: tpu_custom_call.1
= control target key start
LH: loop header
LB: loop body
LE: loop exit
PB: predicated region body
PF: predicated region fallthrough
CT: control target
= control target key end

     0   :  { %s1952_s0 = inlined_call_operand.<no memory space> [shape: s32[1], index: 0, kind: input, shape index: {}]   ;;  %s1953_s1 = inlined_call_operand.hbm [shape: f32[8,128], index: 1, kind: input, shape index: {}]   ;;  %s1954_s2 = inlined_call_operand.vmem [shape: f32[1,32], index: 2, kind: input, shape index: {}]   ;;  %s1955_s3 = inlined_call_operand.vmem [shape: f32[9,4], index: 3, kind: input, shape index: {}]   ;;  %s1956_s4 = inlined_call_operand.vmem [shape: f32[32,128], index: 4, kind: input, shape index: {}]   ;;  %s1957_s5 = inlined_call_operand.hbm [shape: bf16[4,64,384], index: 5, kind: input, shape index: {}]   ;;  %s1958_s6 = inlined_call_operand.hbm [shape: f32[4,8,32], index: 6, kind: input, shape index: {}]   ;;  %s1959_s7 = inlined_call_operand.hbm [shape: f32[1,32], index: 7, kind: output, shape index: {0}]   ;;  %s1960_s8 = inlined_call_operand.vmem [shape: f32[4,9,32], index: 8, kind: output, shape index: {1}]  }
   0x1   :  { %14 = sst [smem:[#allocation3]] %s1952_s0 }
   0x2   :  { %15 = vsyncpa [#allocation5], 0 }
   0x3   :  { %16 = vsyncpa [#allocation8], 0 }
   0x4   :  { %18 = vsyncpa [#allocation8 + $0x1], 0 }
   0x5   :  { %19 = vsyncpa [#allocation6], 0  ;;  %s1628_s29 = smov 0   ;;  %s1630_s30 = smov 0  }
   0x6   :  { %s1632_s9 = smov 0   ;;  %s1634_s10 = smov 0  }
   0x7 LB: > { %s1649_s0 = sadd.s32 1, %s1565_s10   ;;  %s116_s11 = sadd.s32 1, %s1561_s9  ;;  %s1565_s10 = sphi %s1634_s10, %s1982_s10   ;;  %s1561_s9 = sphi %s1632_s9, %s1981_s9   ;;  %s1557_s30 = sphi %s1630_s30, %s1980_s30   ;;  %s1553_s29 = sphi %s1628_s29, %s1979_s29  }
   0x8   : > { %s113_s12 = ssub.s32 %s1565_s10, %s1649_s0  ;;  %p123_p0 = scmp.ne.s32.totalorder %s1561_s9, %s1557_s30 }
   0x9   : > { %p114_p1 = scmp.eq.s32.totalorder %s113_s12, 0  ;;  %p124_p2 = scmp.eq.s32.totalorder %s1565_s10, 0 }
   0xa   : > { %p1328_p3 = scmp.lt.s32.totalorder %s1565_s10, 4  ;;  %s246_s14 = sand.u32 1, %s1565_s10  }
   0xb   : > { %s1659_s13 = scalar_select %p114_p1, %s1561_s9, %s116_s11  }
   0xc   : > { %p125_p4 = por %p124_p2, %p123_p0  ;;  %s248_s15 = sand.u32 1, %s1561_s9  }
   0xd   : > { %s1301_s16 = smul.u32 96, %s248_s15  ;;  %s1677_s24 = scalar_lea.sflag [#allocation8], %s246_s14 }
   0xe   : > { %p1665_p5 = pnand %p1328_p3, %p125_p4  ;;  %s1302_s18 = smul.u32 1536, %s1565_s10 }
   0xf   : > { %s250_s22 = scalar_lea.vmem [#allocation7], %s1301_s16  ;;  %s1414_s28 = scalar_lea.hbm %s1957_s5, 6144 }
  0x10   : > { %s1967_s17 = scalar_select %p1665_p5, 1, 0 }
  0x11   : > { %s1673_s21 = scalar_lea.hbm %s1957_s5, %s1302_s18  ;;  %s257_s23 = sshll.u32 %s250_s22, 4  ;;  %s1675_s23 = int_to_ptr.vmem [resolvable:$true] %s257_s23 }
  0x12   : > { %s1409_s25 = scalar_lea.hbm %s1673_s21, 1536  ;;  %p1962_p7 = pneg %p1665_p5 }
  0x13   : > { %p1410_p6 = scmp.ne.s32.totalorder %s1673_s21, %s1409_s25  ;;  %p1415_p10 = scmp.lt.u32.totalorder %s1673_s21, %s1957_s5 }
  0x14   : > { %p1416_p11 = scmp.lt.u32.totalorder %s1414_s28, %s1409_s25  ;;  %p1418_p13 = scmp.lt.u32.totalorder %s1409_s25, %s1673_s21 }
  0x15   : > { %p1412_p8 = pnand %p1962_p7, %p1410_p6 }
  0x16   : > { %p1417_p12 = por %p1416_p11, %p1415_p10 }
  0x17   : > { %p1413_p9 = pneg %p1412_p8 }
  0x18   : > { %p1419_p0 = por %p1418_p13, %p1417_p12 }
  0x1a   : > { %p1420_p1 = pnand %p1419_p0, %p1413_p9 }
  0x1c   : > { %1423 = shalt.err (!%p1420_p1)
}
  0x1d   : > { %s1424_s14 = scalar_lea.vmem %s1675_s23, 1536  ;;  %s1567_s16 = smov [#allocation7]  }
  0x1e   : > { %p1425_p2 = scmp.ne.s32.totalorder %s1675_s23, %s1424_s14  ;;  %s1429_s18 = sshll.u32 %s1567_s16, 4  ;;  %s1430_s18 = int_to_ptr.vmem [resolvable:$false] %s1429_s18 }
  0x1f   : > { %s1431_s19 = scalar_lea.vmem %s1430_s18, 3072  ;;  %p1432_p6 = scmp.lt.s32.totalorder %s1675_s23, %s1430_s18 }
  0x20   : > { %p1427_p3 = pnand %p1425_p2, %p1962_p7  ;;  %p1433_p8 = scmp.lt.s32.totalorder %s1431_s19, %s1424_s14 }
  0x22   : > { %p1428_p4 = pneg %p1427_p3  ;;  %p1434_p10 = por %p1433_p8, %p1432_p6 }
  0x24   : > { %p1435_p11 = pnand %p1434_p10, %p1428_p4 }
  0x26   : > { %1438 = shalt.err (!%p1435_p11)
}
  0x27   : > { %s1568_s20 = smov 192   ;;  %s1569_s22 = smov 12  }
  0x28   : > { %1323 = dma.hbm_to_vmem [thread:$0]  (!%p1665_p5), %s1673_s21, 1536, %s1675_s23, %s1677_s24, %s1568_s20, %s1568_s20, %s1569_s22  }
  0x29   : > { %s1706_s25 = sadd.s32 4294967295, %s1565_s10   ;;  %p129_p12 = scmp.ne.s32.totalorder %s1557_s30, %s1553_s29 }
  0x2a   : > { %p1961_p9 = scmp.eq.s32.totalorder %s1706_s25, 0  ;;  %p1154_p13 = scmp.ge.s32.totalorder %s1565_s10, 1 }
  0x2b   : > { %p213_p0 = scmp.lt.s32.totalorder %s1565_s10, 5  ;;  %s1570_s21 = smov [#allocation4]  }
  0x2c   : > { %p1716_p2 = por %p1961_p9, %p129_p12  ;;  %s226_s23 = sshll.u32 %s1570_s21, 4  ;;  %s227_s23 = int_to_ptr.vmem [resolvable:$true] %s226_s23 }
  0x2d   : > { %p1720_p3 = pnand %p1154_p13, %p213_p0  ;;  %s1158_s28 = sshll.u32 %s248_s15, 3 }
  0x2e   : > { %s1968_s26 = scalar_select %p1716_p2, 1, 0 }
  0x2f   : > { %s1969_s27 = scalar_select %p1720_p3, 1, 0 }
  0x30   : > { %p1316_p4 = pneg %p1720_p3  ;;  %s1159_s29 = sshll.u32 %s1565_s10, 7 }
  0x31   : > { %s271_s11 = scalar_lea.vmem [#allocation9], %s1158_s28  ;;  %s1738_s19 = scalar_lea.hbm %s1958_s6, %s1159_s29 }
  0x32   : > { %s278_s12 = sshll.u32 %s271_s11, 4  ;;  %p1731_p6 = pnand %p1316_p4, %p1961_p9  ;;  %s1740_s12 = int_to_ptr.vmem [resolvable:$true] %s278_s12 }
  0x33   : > { %s1439_s10 = scalar_lea.hbm %s1953_s1, 128 }
  0x34   : > { %p1440_p8 = scmp.ne.s32.totalorder %s1953_s1, %s1439_s10  ;;  %p1441_p10 = pneg %p1731_p6 }
  0x35   : > { %p1446_p13 = scmp.lt.u32.totalorder %s1439_s10, %s1953_s1 }
  0x36   : > { %p1442_p11 = pnand %p1441_p10, %p1440_p8 }
  0x38   : > { %p1443_p12 = pneg %p1442_p11 }
  0x3a   : > { %p1448_p0 = pnand %p1446_p13, %p1443_p12 }
  0x3c   : > { %1451 = shalt.err (!%p1448_p0)
}
  0x3d   : > { %s1452_s29 = scalar_lea.vmem %s227_s23, 128  ;;  %p1460_p7 = scmp.lt.s32.totalorder %s227_s23, %s227_s23 }
  0x3e   : > { %p1453_p4 = scmp.ne.s32.totalorder %s227_s23, %s1452_s29  ;;  %p1461_p2 = scmp.lt.s32.totalorder %s1452_s29, %s1452_s29 }
  0x40   : > { %p1455_p1 = pnand %p1453_p4, %p1441_p10  ;;  %p1462_p3 = por %p1461_p2, %p1460_p7 }
  0x42   : > { %p1456_p9 = pneg %p1455_p1 }
  0x44   : > { %p1463_p5 = pnand %p1462_p3, %p1456_p9 }
  0x46   : > { %1466 = shalt.err (!%p1463_p5)
}
  0x47   : > { %1319 = dma.hbm_to_vmem [thread:$0]  (!%p1731_p6), %s1953_s1, 128, %s227_s23, [#allocation5]  }
  0x48   : > { %s1467_s15 = scalar_lea.hbm %s1738_s19, 128  ;;  %p1971_p10 = scmp.ne.s32.totalorder %s1967_s17, 0 }
  0x49   : > { %p1468_p8 = scmp.ne.s32.totalorder %s1738_s19, %s1467_s15  ;;  %s1472_s22 = scalar_lea.hbm %s1958_s6, 512 }
  0x4a   : > { %p1972_p1 = pneg %p1971_p10  ;;  %p1473_p5 = scmp.lt.u32.totalorder %s1738_s19, %s1958_s6 }
  0x4b   : > { %p1474_p7 = scmp.lt.u32.totalorder %s1472_s22, %s1467_s15  ;;  %p1476_p2 = scmp.lt.u32.totalorder %s1467_s15, %s1738_s19 }
  0x4c   : > { %p1470_p11 = pnand %p1468_p8, %p1972_p1 }
  0x4d   : > { %p1475_p9 = por %p1474_p7, %p1473_p5 }
  0x4e   : > { %p1471_p12 = pneg %p1470_p11 }
  0x4f   : > { %p1477_p3 = por %p1476_p2, %p1475_p9 }
  0x51   : > { %p1478_p13 = pnand %p1477_p3, %p1471_p12 }
  0x53   : > { %1481 = shalt.err (!%p1478_p13)
}
  0x54   : > { %s1482_s23 = scalar_lea.vmem %s1740_s12, 128  ;;  %p1973_p0 = pmov %p1972_p1 }
  0x55   : > { %p1483_p6 = scmp.ne.s32.totalorder %s1740_s12, %s1482_s23  ;;  %s1571_s28 = smov [#allocation9]  }
  0x56   : > { %s1487_s11 = sshll.u32 %s1571_s28, 4  ;;  %s1488_s11 = int_to_ptr.vmem [resolvable:$false] %s1487_s11 }
  0x57   : > { %p1485_p4 = pnand %p1483_p6, %p1973_p0  ;;  %s1489_s29 = scalar_lea.vmem %s1488_s11, 256 }
  0x58   : > { %p1490_p1 = scmp.lt.s32.totalorder %s1740_s12, %s1488_s11  ;;  %p1491_p11 = scmp.lt.s32.totalorder %s1489_s29, %s1482_s23 }
  0x59   : > { %p1486_p8 = pneg %p1485_p4 }
  0x5a   : > { %p1492_p5 = por %p1491_p11, %p1490_p1 }
  0x5c   : > { %p1493_p7 = pnand %p1492_p5, %p1486_p8 }
  0x5e   : > { %1496 = shalt.err (!%p1493_p7)
}
  0x5f   : > { %1326 = dma.hbm_to_vmem [thread:$0]  (!%p1971_p10), %s1738_s19, 128, %s1740_s12, %s1677_s24  }
  0x60   : > { %p1974_p12 = scmp.ne.s32.totalorder %s1969_s27, 0 }
  0x61   : > { %p1975_p9 = scmp.eq.s32.totalorder (!%p1974_p12), %s1706_s25, 0 }
  0x62   : > { %287 = sbr.rel (%p1974_p12) target bundleno = 2401 (0x961), region = 44 }
  0x69   : > { %1540 = dma.done.wait (%p1975_p9), [#allocation5], 128   ;;  %p1976_p2 = pmov %p1975_p9 }
  0x6a   : > { %s293_s16 = sand.u32 1, %s1706_s25   ;;  %s295_s18 = sand.u32 1, %s1557_s30  }
  0x6b   : > { %1542 = vsyncadd (%p1976_p2), [#allocation5], 4294967168  ;;  %s1303_s15 = smul.u32 96, %s295_s18  ;;  %s294_s17 = scalar_lea.sflag [#allocation8], %s293_s16 }
  0x6c   : > { %p1977_p3 = scmp.ne.s32.totalorder %s1968_s26, 0 }
  0x6d   : > { %s1790_s20 = scalar_lea.vmem [#allocation7], %s1303_s15 }
  0x6e   : > { %1544 = dma.done.wait (%p1977_p3), %s294_s17, 1664  }
  0x6f   : > { %1546 = vsyncadd (%p1977_p3), %s294_s17, 4294965632  ;;  %s1796_s24 = sshll.u32 %s295_s18, 3  ;;  %p342_p10 = scmp.lt.s32.totalorder %s1706_s25, 3 }
  0x70   : > { %s306_s14 = scalar_lea.vmem [#allocation9], %s1796_s24  ;;  %p1978_p13 = scmp.ne.s32.totalorder %s1706_s25, 0 }
  0x71   : > { %s343_s27 = scalar_select %p342_p10, %s1706_s25, 3 }
  0x72   : > { %351 = sbr.rel (%p1978_p13) target bundleno = 121 (0x79), region = 60  ;;  %v352_v0 = vld [vmem:[%s1954_s2] sm:$0x1] (!%p1978_p13)  ;;  %vm353_vm0 = vcmask (!%p1978_p13), 253952  }
  0x73   : > { %s1192_s12 = sshll.u32 %s343_s27, 4  ;;  %354 = vst.msk [vmem:[#allocation10] sm:$0x1] (!%p1978_p13), %vm353_vm0, %v352_v0 }
  0x74   : > { %s1803_s22 = scalar_lea.vmem %s1960_s8, %s1192_s12 }
  0x79 PF: > { %vm379_vm1 = vcmask 253952   ;;  %v1572_v4 = vmov 1966171168   ;;  %v392_v6 = vlaneseq  ;;  %v356_v9 = vld [vmem:[%s1790_s20 + $0x8] sm:$0x1]  ;;  %v1573_v15 = vmov 0.0  }
  0x7a   : > { %v1811_v1 = vld [vmem:[#allocation10] sm:$0x1]  ;;  %v390_v5 = vunpack.c.l.s4 %v1572_v4  ;;  %v357_v10 = vunpack.c.l.bf16 %v356_v9  ;;  %v1385_v14 = vld [vmem:[%s1790_s20] ss:$12 sps:$4 sm:$0xff]   ;;  %1222 = vmatprep.subr.bf16.mxu0 %v1573_v15  ;;  %s1574_s23 = smov 64   ;;  %vm1575_vm2 = vmmov 0  }
  0x7b   : > { %v378_v2 = vmul.f32 %v1811_v1, %v1811_v1  ;;  %v1816_v8 = vshrl.u32 %v392_v6, 7  ;;  %1223 = vmatpush3.bf16.msra.mxu0 %v1385_v14  ;;  %v1386_v16 = vld [vmem:[%s1790_s20 + $0x18] ss:$12 sps:$4 sm:$0xff]   ;;  %1226 = vmatprep.mubr.msk.bf16.mxu0 %vm1575_vm2, %v1573_v15  ;;  %vm420_vm3 = vcmask 261120   ;;  %s464_s28 = sld [smem:[#allocation3]]  ;;  %v482_v35 = vld [vmem:[%s1956_s4 + $0x10] sm:$0xff] }
  0x7c   : > { %v391_v7 = vunpack.c.0.s8 %v390_v5  ;;  %1224 = vmatprep.subr.bf16.mxu0 %v1573_v15  ;;  %v480_v27 = vld [vmem:[%s1956_s4] sm:$0xff]  ;;  %v481_v28 = vld [vmem:[%s1956_s4 + $0x8] sm:$0xff]  ;;  %v483_v36 = vld [vmem:[%s1956_s4 + $0x18] sm:$0xff]  ;;  %s1576_s10 = smov 124   ;;  %s1577_s24 = smov 96   ;;  %vm708_vm4 = vcmask 1043456  }
  0x7d   : > { %v380_v3 = vsel %vm379_vm1, %v378_v2, 0.0  ;;  %v1375_v33 = vpack.i.bf16 %v481_v28, %v480_v27  ;;  %v473_v34 = vld [vmem:[%s306_s14] sm:$0xff]  ;;  %v1380_v37 = vpack.i.bf16 %v483_v36, %v482_v35  ;;  %v698_v41 = vld [vmem:[%s1956_s4] sm:$0xf]  ;;  %s1578_s26 = smov 60   ;;  %v1293_v49 = vpack.c.bf16 %v481_v28, %v480_v27  ;;  %p1330_p6 = scmp.eq.s32.totalorder %s1706_s25, 3 }
  0x7e   : > { %381 = vadd.xlane.f32.xlu0 %v380_v3  ;;  %v1820_v11 = vsub.s32 %v391_v7, %v1816_v8  ;;  %478 = vst.msk [vmem:[%s1803_s22] sm:$0xff] %vm420_vm3, %v473_v34  ;;  %v1297_v51 = vpack.c.bf16 %v483_v36, %v482_v35  ;;  %v582_v52 = vsub.s32 0, %v1816_v8  ;;  %v587_v59 = vld [vmem:[%s1955_s3 + $0x8] sm:$0x1]  ;;  %v586_v60 = vld [vmem:[%s1955_s3] sm:$0xff]  ;;  %vm671_vm5 = vcmask 24576  }
  0x7f   : > { %1225 = vmatpush3.bf16.msra.mxu0 %v1386_v16  ;;  %vm669_vm6 = vcmask 31744   ;;  %vm983_vm7 = vcmask 523264  }
  0x80   : > { %v1823_v12 = vrot.slane %v357_v10, %v1820_v11 }
  0x81   : > { %s465_s11 = scalar_lea.vmem [#allocation4], %s464_s28 }
  0x82   : > { %v402_v13 = vrot.slane %v1823_v12, %v1820_v11  ;;  %v466_v25 = vld [vmem:[%s465_s11] sm:$0x1] }
  0x94   : > { %403 = vrot.lane.b32.xlu0 %v402_v13, %s1574_s23 }
 0x10b   : > { %v382_v17 = vpop.xlane.xlu0 %381 }
 0x10c   : > { %v384_v18 = vmul.f32 0.03125, %v382_v17 }
 0x10e   : > { %v385_v19 = vadd.f32 1e-06, %v384_v18 }
 0x10f   : > { %v404_v21 = vpop.permute.xlu0 %403 }
 0x110   : > { %1395 = vrsqrt.f32 %v385_v19 }
 0x11a   : > { %v1396_v20 = vpop.eup %1395 }
 0x11b   : > { %v387_v22 = vmul.f32 %v1396_v20, %v1811_v1 }
 0x11d   : > { %v406_v23 = vmul.f32 %v404_v21, %v387_v22 }
 0x11f   : > { %v407_v24 = vpack.c.bf16 %v406_v23, %v406_v23 }
 0x121   : > { %1227 = vmatmul.mubr.msk.bf16.vlgmr.msra.gmra.mrb[0].mxu0 %vm420_vm3, %v407_v24 }
 0x122   : > { %1238 = vmatprep.mubr.msk.f32.mxu0 %vm420_vm3, %v473_v34 }
 0x1f4   : > { %v458_v26 = vpop.f32.mrb[0].mxu0 }
 0x1f5   : > { %v467_v29 = vmul.f32 %v466_v25, %v458_v26  ;;  %v1228_v30 = vpop.f32.mrb[1].mxu0 }
 0x1f6   : > { %v461_v31 = vpop.f32.mrb[2].mxu0 }
 0x1f7   : > { %469 = vrot.lane.b32.xlu1 %v467_v29, %s1574_s23  ;;  %v1229_v32 = vpop.f32.mrb[3].mxu0 }
 0x1f8   : > { %v1387_v32 = vld [vmem:[%s1790_s20 + $0x8] ss:$12 sps:$4 sm:$0xff]  }
 0x1fb   : > { %1376 = vrot.lane.b32.xlu1 %v1375_v33, %s1576_s10  ;;  %v1388_v33 = vld [vmem:[%s1790_s20 + $0x20] ss:$12 sps:$4 sm:$0xff]  }
 0x1ff   : > { %1381 = vrot.lane.b32.xlu1 %v1380_v37, %s1576_s10 }
 0x269   : > { %v470_v38 = vpop.permute.xlu1 %469 }
 0x26a   : > { %v472_v39 = vadd.f32 %v470_v38, %v467_v29 }
 0x26c   : > { %475 = vrot.lane.b32.xlu1 %v472_v39, %s1577_s24  ;;  %v583_v53 = vrot.slane %v472_v39, %v582_v52 }
 0x26d   : > { %v1377_v40 = vpop.permute.xlu1 %1376 }
 0x26e   : > { %v1379_v42 = vunpack.i.h.bf16 %v1377_v40  ;;  %v1378_v43 = vunpack.i.l.bf16 %v1377_v40 }
 0x270   : > { %v1285_v44 = vpack.c.bf16 %v1379_v42, %v1378_v43  ;;  %700 = vrot.lane.b32.xlu1 %v698_v41, %s1578_s26 }
 0x271   : > { %v1382_v45 = vpop.permute.xlu1 %1381 }
 0x272   : > { %v1384_v46 = vunpack.i.h.bf16 %v1382_v45  ;;  %v1383_v47 = vunpack.i.l.bf16 %v1382_v45  ;;  %1286 = vmatprep.subr.bf16.mxu0 %v1285_v44 }
 0x273   : > { %1288 = vmatpush3.bf16.msra.mxu0 %v1285_v44 }
 0x274   : > { %v1289_v48 = vpack.c.bf16 %v1384_v46, %v1383_v47 }
 0x276   : > { %1290 = vmatprep.subr.bf16.mxu0 %v1289_v48 }
 0x277   : > { %1292 = vmatpush3.bf16.msra.mxu0 %v1289_v48 }
 0x278   : > { %1294 = vmatprep.subr.bf16.mxu0 %v1293_v49 }
 0x2de   : > { %v476_v50 = vpop.permute.xlu1 %475 }
 0x2df   : > { %479 = vst.msk [vmem:[%s1803_s22 + $0x8] sm:$0x1] %vm379_vm1, %v476_v50  ;;  %1239 = vmatmul.mubr.msk.f32.vlgmr.msra.gmra.mrb[4].mxu0 %vm420_vm3, %v476_v50  ;;  %v870_v50 = vcombine.high %v1823_v12, %v1823_v12  ;;  %v1390_v12 = vld [vmem:[%s1790_s20 + $0x1c] ss:$12 sps:$4 sm:$0xff]  }
 0x2e0   : > { %1296 = vmatpush3.bf16.msra.mxu0 %v1293_v49 }
 0x2e1   : > { %1298 = vmatprep.subr.bf16.mxu0 %v1297_v51 }
 0x2e2   : > { %v701_v58 = vpop.permute.xlu1 %700 }
 0x2e3   : > { %1252 = vmatprep.subr.msk.mxu1 %vm708_vm4, %v701_v58 }
 0x2e4   : > { %1300 = vmatpush3.bf16.msra.mxu0 %v1297_v51  ;;  %1253 = vmatpush3.msk.msra.mxu1 %vm708_vm4, %v701_v58  ;;  %v877_v51 = vrot.slane %v870_v50, %v1820_v11  ;;  %v1391_v11 = vld [vmem:[%s1790_s20 + $0x8] ss:$12 sps:$4 sm:$0xff]  }
 0x2e5   : > { %1265 = vmatprep.subr.bf16.mxu0 %v1573_v15  ;;  %1257 = vmatprep.subr.bf16.mxu1 %v1573_v15 }
 0x3b2   : > { %v1240_v54 = vpop.f32.mrb[4].mxu0 }
 0x3b3   : > { %v585_v55 = vmul.f32 %v1240_v54, %v583_v53  ;;  %v571_v56 = vpop.f32.mrb[5].mxu0 }
 0x3b4   : > { %v584_v57 = vmul.f32 %v583_v53, %v571_v56  ;;  %788 = vrot.lane.b32.xlu1 %v571_v56, %s1577_s24 }
 0x3b6   : > { %1249 = vmatprep.mubr.msk.f32.mxu0 %vm420_vm3, %v584_v57 }
 0x3b7   : > { %1250 = vmatmul.mubr.msk.f32.vlgmr.msra.gmra.mrb[6].mxu0 %vm420_vm3, %v585_v55 }
 0x3b8   : > { %790 = vrot.lane.b32.xlu1 %v1240_v54, %s1577_s24  ;;  %1269 = vmatprep.mubr.msk.bf16.mxu0 %vm1575_vm2, %v1573_v15 }
 0x3bc   : > { %878 = vrot.lane.b32.xlu1 %v877_v51, %s1574_s23 }
 0x3c0   : > { %971 = vrot.lane.b32.xlu1 %v1391_v11, %s1577_s24 }
 0x426   : > { %v789_v34 = vpop.permute.xlu1 %788 }
 0x42a   : > { %v791_v35 = vpop.permute.xlu1 %790 }
 0x48a   : > { %v1251_v61 = vpop.f32.mrb[6].mxu0 }
 0x48b   : > { %v666_v62 = vadd.f32 %v1251_v61, %v587_v59  ;;  %v660_v63 = vpop.f32.mrb[7].mxu0  ;;  %v1389_v59 = vld [vmem:[%s1790_s20 + $0x4] ss:$12 sps:$4 sm:$0xff]  }
 0x48c   : > { %v661_v0 = vadd.f32 %v660_v63, %v586_v60  ;;  %1266 = vmatpush3.bf16.msra.mxu0 %v1389_v59  ;;  %v1392_v60 = vld [vmem:[%s1790_s20 + $0x20] ss:$12 sps:$4 sm:$0xff]  }
 0x48d   : > { %v672_v2 = vsel %vm671_vm5, %v666_v62, -inf  ;;  %1267 = vmatprep.subr.bf16.mxu0 %v1573_v15  ;;  %973 = vrot.lane.b32.xlu1 %v1392_v60, %s1577_s24 }
 0x48e   : > { %v670_v3 = vsel %vm669_vm6, %v661_v0, -inf }
 0x48f   : > { %v673_v4 = vmax.f32 %v670_v3, %v672_v2  ;;  %v879_v2 = vpop.permute.xlu1 %878 }
 0x490   : > { %1268 = vmatpush3.bf16.msra.mxu0 %v1390_v12 }
 0x491   : > { %v674_v5 = vrot.slane %v673_v4, 4 }
 0x493   : > { %v675_v6 = vmax.f32 %v673_v4, %v674_v5 }
 0x495   : > { %v676_v7 = vrot.slane %v675_v6, 2 }
 0x497   : > { %v677_v8 = vmax.f32 %v675_v6, %v676_v7  ;;  %v972_v6 = vpop.permute.xlu1 %971 }
 0x499   : > { %v678_v9 = vrot.slane %v677_v8, 1 }
 0x49b   : > { %v679_v10 = vmax.f32 %v677_v8, %v678_v9 }
 0x49d   : > { %v680_v13 = vsub.f32 %v661_v0, %v679_v10  ;;  %v681_v14 = vsub.f32 %v666_v62, %v679_v10 }
 0x49f   : > { %v682_v16 = vmul.f32 1.442695, %v680_v13  ;;  %v684_v17 = vmul.f32 1.442695, %v681_v14  ;;  %v1394_v13 = vld [vmem:[%s1790_s20 + $0x50] ss:$12 sps:$4 sm:$0xff]  }
 0x4a1   : > { %1397 = vpow2.f32 %v682_v16 }
 0x4a2   : > { %1399 = vpow2.f32 %v684_v17 }
 0x4ab   : > { %v1398_v18 = vpop.eup %1397 }
 0x4ac   : > { %v1400_v19 = vpop.eup %1399  ;;  %v686_v20 = vsel %vm669_vm6, %v1398_v18, 0.0 }
 0x4ad   : > { %v687_v21 = vsel %vm671_vm5, %v1400_v19, 0.0 }
 0x4ae   : > { %v688_v22 = vadd.f32 %v687_v21, %v686_v20 }
 0x4b0   : > { %v689_v23 = vrot.slane %v688_v22, 4 }
 0x4b2   : > { %v690_v24 = vadd.f32 %v689_v23, %v688_v22 }
 0x4b4   : > { %v691_v25 = vrot.slane %v690_v24, 2 }
 0x4b6   : > { %v692_v26 = vadd.f32 %v691_v25, %v690_v24 }
 0x4b8   : > { %v693_v27 = vrot.slane %v692_v26, 1 }
 0x4ba   : > { %v694_v28 = vadd.f32 %v693_v27, %v692_v26 }
 0x4bc   : > { %1401 = vrcp.f32 %v694_v28 }
 0x4c6   : > { %v1402_v29 = vpop.eup %1401 }
 0x4c7   : > { %v696_v30 = vmul.f32 %v1402_v29, %v1398_v18  ;;  %v697_v31 = vmul.f32 %v1402_v29, %v1400_v19 }
 0x4c9   : > { %1254 = vmatprep.mubr.msk.f32.mxu1 %vm669_vm6, %v696_v30 }
 0x4ca   : > { %1255 = vmatmul.mubr.msk.f32.vlgmr.msra.gmra.mrb[0].mxu1 %vm669_vm6, %v697_v31 }
 0x4cb   : > { %1261 = vmatprep.mubr.msk.bf16.mxu1 %vm1575_vm2, %v1573_v15  ;;  %1258 = vmatpush3.bf16.msra.mxu1 %v1387_v32 }
 0x4cc   : > { %1259 = vmatprep.subr.bf16.mxu1 %v1573_v15 }
 0x4cf   : > { %1260 = vmatpush3.bf16.msra.mxu1 %v1388_v33 }
 0x4d0   : > { %1273 = vmatprep.subr.bf16.mxu1 %v1573_v15 }
 0x4ff   : > { %v974_v7 = vpop.permute.xlu1 %973 }
 0x59d   : > { %v1256_v36 = vpop.f32.mrb[0].mxu1 }
 0x59e   : > { %v795_v37 = vmul.f32 %v1256_v36, %v791_v35  ;;  %v777_v38 = vpop.f32.mrb[1].mxu1 }
 0x59f   : > { %v794_v39 = vmul.f32 %v789_v34, %v777_v38 }
 0x5a0   : > { %v797_v40 = vsel %vm379_vm1, %v795_v37, 0.0 }
 0x5a1   : > { %v796_v41 = vsel %vm420_vm3, %v794_v39, 0.0 }
 0x5a2   : > { %v798_v42 = vadd.f32 %v797_v40, %v796_v41 }
 0x5a4   : > { %v799_v43 = vrot.slane %v798_v42, 4 }
 0x5a6   : > { %v800_v44 = vadd.f32 %v799_v43, %v798_v42 }
 0x5a8   : > { %v801_v45 = vrot.slane %v800_v44, 2 }
 0x5aa   : > { %v802_v46 = vadd.f32 %v801_v45, %v800_v44 }
 0x5ac   : > { %v803_v47 = vrot.slane %v802_v46, 1 }
 0x5ae   : > { %v804_v48 = vadd.f32 %v803_v47, %v802_v46 }
 0x5b0   : > { %v805_v49 = vpack.c.bf16 %v804_v48, %v804_v48 }
 0x5b2   : > { %1262 = vmatmul.mubr.msk.bf16.vlgmr.msra.gmra.mrb[4].mxu1 %vm420_vm3, %v805_v49 }
 0x5b3   : > { %1281 = vmatprep.mubr.msk.bf16.mxu1 %vm1575_vm2, %v1573_v15  ;;  %1274 = vmatpush3.bf16.msra.mxu1 %v972_v6 }
 0x5b4   : > { %1275 = vmatprep.subr.bf16.mxu1 %v1573_v15 }
 0x5b7   : > { %1276 = vmatpush3.bf16.msra.mxu1 %v974_v7 }
 0x5b8   : > { %1277 = vmatprep.subr.bf16.mxu1 %v1573_v15 }
 0x685   : > { %v855_v52 = vpop.f32.mrb[4].mxu1 }
 0x686   : > { %v861_v53 = vadd.f32 %v855_v52, %v1811_v1  ;;  %v1263_v54 = vpop.f32.mrb[5].mxu1  ;;  %v1393_v1 = vld [vmem:[%s1790_s20 + $0x38] ss:$12 sps:$4 sm:$0xff]   ;;  %s1579_s20 = smov [#allocation10]  }
 0x687   : > { %v858_v55 = vpop.f32.mrb[6].mxu1  ;;  %975 = vrot.lane.b32.xlu1 %v1393_v1, %s1577_s24 }
 0x688   : > { %v1264_v56 = vpop.f32.mrb[7].mxu1  ;;  %v862_v57 = vmul.f32 %v861_v53, %v861_v53 }
 0x68a   : > { %v863_v58 = vsel %vm379_vm1, %v862_v57, 0.0 }
 0x68b   : > { %864 = vadd.xlane.f32.xlu0 %v863_v58 }
 0x6f9   : > { %v976_v8 = vpop.permute.xlu1 %975 }
 0x6fa   : > { %1278 = vmatpush3.bf16.msra.mxu1 %v976_v8 }
 0x6fb   : > { %1279 = vmatprep.subr.bf16.mxu1 %v1573_v15 }
 0x718   : > { %v865_v61 = vpop.xlane.xlu0 %864 }
 0x719   : > { %v866_v62 = vmul.f32 0.03125, %v865_v61 }
 0x71b   : > { %v867_v63 = vadd.f32 1e-06, %v866_v62 }
 0x71d   : > { %1403 = vrsqrt.f32 %v867_v63 }
 0x727   : > { %v1404_v0 = vpop.eup %1403 }
 0x728   : > { %v869_v3 = vmul.f32 %v1404_v0, %v861_v53 }
 0x72a   : > { %v881_v4 = vmul.f32 %v879_v2, %v869_v3 }
 0x72c   : > { %v882_v5 = vpack.c.bf16 %v881_v4, %v881_v4 }
 0x72e   : > { %1270 = vmatmul.mubr.msk.bf16.vlgmr.msra.gmra.mrb[8].mxu0 %vm420_vm3, %v882_v5 }
 0x801   : > { %v932_v9 = vpop.f32.mrb[8].mxu0 }
 0x802   : > { %946 = vrot.lane.b32.xlu1 %v932_v9, %s1574_s23  ;;  %v1271_v10 = vpop.f32.mrb[9].mxu0  ;;  %v1182_v17 = vmul.f32 -1.442695, %v932_v9  ;;  %s1041_s23 = sshll.u32 %s1579_s20, 4  ;;  %s1042_s23 = int_to_ptr.vmem [resolvable:$true] %s1041_s23 }
 0x803   : > { %v935_v14 = vpop.f32.mrb[10].mxu0  ;;  %s1497_s16 = scalar_lea.vmem %s1042_s23, 16  ;;  %s1503_s18 = scalar_lea.vmem %s1042_s23, 32 }
 0x804   : > { %v1272_v16 = vpop.f32.mrb[11].mxu0  ;;  %1405 = vpow2.f32 %v1182_v17  ;;  %p1498_p0 = scmp.ne.s32.totalorder %s1042_s23, %s1497_s16  ;;  %p1504_p1 = scmp.lt.s32.totalorder %s1042_s23, %s1042_s23 }
 0x805   : > { %p1505_p11 = scmp.lt.s32.totalorder %s1503_s18, %s1497_s16 }
 0x806   : > { %977 = vrot.lane.b32.xlu1 %v1394_v13, %s1577_s24  ;;  %p1499_p4 = pnand %p1498_p0, %p1330_p6 }
 0x807   : > { %p1506_p5 = por %p1505_p11, %p1504_p1 }
 0x808   : > { %p1500_p8 = pneg %p1499_p4 }
 0x80a   : > { %p1507_p7 = pnand %p1506_p5, %p1500_p8 }
 0x80e   : > { %v1406_v18 = vpop.eup %1405 }
 0x80f   : > { %v941_v19 = vadd.f32 1.0, %v1406_v18 }
 0x811   : > { %1407 = vrcp.f32 %v941_v19 }
 0x81b   : > { %v1408_v20 = vpop.eup %1407 }
 0x81c   : > { %v944_v22 = vmul.f32 %v1408_v20, %v932_v9 }
 0x874   : > { %v947_v21 = vpop.permute.xlu1 %946 }
 0x875   : > { %v949_v23 = vmul.f32 %v947_v21, %v944_v22 }
 0x877   : > { %v950_v24 = vpack.c.bf16 %v949_v23, %v949_v23 }
 0x878   : > { %v978_v15 = vpop.permute.xlu1 %977 }
 0x879   : > { %1280 = vmatpush3.bf16.msra.mxu1 %v978_v15 }
 0x87c   : > { %1282 = vmatmul.mubr.msk.bf16.vlgmr.msra.gmra.mrb[8].mxu1 %vm983_vm7, %v950_v24 }
 0x94f   : > { %v1021_v25 = vpop.f32.mrb[8].mxu1 }
 0x950   : > { %v1027_v26 = vadd.f32 %v1021_v25, %v861_v53  ;;  %v1283_v27 = vpop.f32.mrb[9].mxu1 }
 0x951   : > { %v1024_v28 = vpop.f32.mrb[10].mxu1 }
 0x952   : > { %1028 = vst.msk [vmem:[#allocation10] sm:$0x1] %vm379_vm1, %v1027_v26  ;;  %v1284_v29 = vpop.f32.mrb[11].mxu1 }
 0x953   : > { %1510 = shalt.err (!%p1507_p7)
}
 0x954   : > { %s1511_s27 = scalar_lea.hbm %s1959_s7, 16 }
 0x955   : > { %p1512_p12 = scmp.ne.s32.totalorder %s1959_s7, %s1511_s27  ;;  %p1517_p3 = scmp.lt.u32.totalorder %s1511_s27, %s1959_s7 }
 0x957   : > { %p1513_p9 = pnand %p1512_p12, %p1330_p6 }
 0x959   : > { %p1514_p2 = pneg %p1513_p9 }
 0x95b   : > { %p1519_p10 = pnand %p1517_p3, %p1514_p2 }
 0x95d   : > { %1522 = shalt.err (!%p1519_p10)
}
 0x95e   : > { %1313 = dma.vmem_to_hbm [thread:$0]  (%p1330_p6), %s1042_s23, 16, %s1959_s7, [#allocation6]  }
 0x95f   : > { %1548 = dma.done.wait (%p1330_p6), [#allocation6], 16  }
 0x960   : > { %1550 = vsyncadd (%p1330_p6), [#allocation6], 4294967280 }
 0x961 PF: > { %p22_p13 = scmp.ge.s32.totalorder %s1649_s0, 6   ;;  %s1979_s29 = smov %s1557_s30 }
 0x962   : > { %s1980_s30 = smov %s1561_s9  ;;  %s1981_s9 = smov %s1659_s13 }
 0x963   : > { %s1982_s10 = smov %s1649_s0  ;;  %24 = sbr.rel (!%p22_p13) target bundleno = 7 (0x7), region = 114 }
 0x96a   :  { %1065 = vsyncpa [#allocation5], 1 }
 0x96b   :  { %1067 = vsyncpa [#allocation5 + $0x1], 1 }
 0x96c   :  { %1068 = vsyncpa [#allocation8], 1 }
 0x96d   :  { %1070 = vsyncpa [#allocation8 + $0x1], 1 }
 0x96e   :  { %1071 = vsyncpa [#allocation6], 1 }
 0x96f   :  { %1073 = vsyncpa [#allocation6 + $0x1], 1 }

</bundles_post_ra>
